<compile_context>
chip_gen: v5e
topology: v5e:2x2
jax: 0.10.0
libtpu: 0.0.40
codegen_flags: <defaults>
</compile_context>

<pallas_src>
import functools

import jax
import jax.numpy as jnp
from jax.experimental import pallas as pl
from jax.experimental.pallas import tpu as pltpu

CONST = 1e-4  # value of the registered 'const' buffer


def _softplus(x):
    # Numerically stable softplus: log1p(exp(-|x|)) + max(x, 0)
    return jnp.log1p(jnp.exp(-jnp.abs(x))) + jnp.maximum(x, 0.0)


def _attn_pool_kernel(f_ref, ft_ref, w_ref, o_ref, *, approx_recip):
    # f_ref : (bb, S, C)  features, channels lane-dense (first matmul lhs)
    # ft_ref: (bb, C, S)  pre-transposed features (second matmul lhs; avoids
    #                     an in-kernel XLU transpose for the S-contraction)
    # w_ref : (bb, C, P)  per-class attention weights
    # o_ref : (bb, C, P)  pooled output (f32)
    f = f_ref[...]
    w = w_ref[...]

    # scores[b,s,p] = sum_c f[b,s,c] * w[b,c,p]  -> native (S,C)@(C,P) MXU
    # matmul per batch; bf16 operands on the fast path, f32 accumulation.
    scores = jnp.einsum("bsc,bcp->bsp", f, w,
                        preferred_element_type=jnp.float32)        # (bb,S,P)

    # Softplus + normalization in f32 on the VPU/EUP.
    att_num = _softplus(scores) + CONST                            # (bb,S,P)
    denom = jnp.sum(att_num, axis=1, keepdims=True)                # (bb,1,P)
    att = att_num * pl.reciprocal(denom, approx=approx_recip)      # (bb,S,P)

    # out[b,c,p] = sum_s ft[b,c,s] * att[b,s,p].  K = S = 16, so the f32 MXU
    # pass is ~free and keeps att unrounded (the dominant error source).
    ft = ft_ref[...].astype(jnp.float32)                           # (bb,C,S)
    o_ref[...] = jnp.einsum("bcs,bsp->bcp", ft, att,
                            preferred_element_type=jnp.float32)    # (bb,C,P)


def _tensorcores_per_chip():
    """Heuristic: dual-TC on v7x, single TC otherwise (v5e / v6e)."""
    try:
        kind = jax.devices()[0].device_kind.lower()
    except Exception:
        return 1
    return 2 if ("v7" in kind or "7x" in kind) else 1


_MAX_BATCH_BLOCK = 32  # ~0.5 MiB/batch double-buffered -> <= ~16 MiB per step


def _pick_batch_block(B):
    """Largest bb dividing B that (a) keeps the per-step block well inside
    VMEM and (b) yields >= num_tensorcores grid steps, so dual-TC v7x gets
    both cores busy while single-TC v5e/v6e collapse to a single grid step."""
    min_steps = min(_tensorcores_per_chip(), B)
    best = 1
    for bb in range(1, B + 1):
        if B % bb:
            continue
        if bb <= _MAX_BATCH_BLOCK and B // bb >= min_steps:
            best = bb
    return best


def attentional_pooling(features, weights, *, mm_dtype=jnp.bfloat16,
                        batch_block=None):
    """features: (B, C, H, W), weights: (B, C, P) -> (B, C, P) float32."""
    B, C, H, W = features.shape
    P = weights.shape[-1]
    S = H * W

    exact = jnp.dtype(mm_dtype) == jnp.dtype(jnp.float32)

    # Lane-dense relayouts (wrapper-side plumbing, fusable into the call):
    #   f  : (B, S, C) -- channels on the lane axis for the first matmul
    #   ft : (B, C, S) -- plain reshape of NCHW, lhs of the second matmul
    # bf16 inputs halve HBM->VMEM bytes on this DMA/latency-bound call.
    f = jnp.transpose(features, (0, 2, 3, 1)).reshape(B, S, C).astype(mm_dtype)
    ft = features.reshape(B, C, S).astype(mm_dtype)
    w = weights.astype(mm_dtype)

    bb = _pick_batch_block(B) if batch_block is None else batch_block
    assert B % bb == 0, (B, bb)
    grid = (B // bb,)

    in_bytes = jnp.dtype(mm_dtype).itemsize
    cost = pl.CostEstimate(
        flops=4 * B * S * C * P,                # two matmuls per batch
        transcendentals=2 * B * S * P,          # exp + log1p per score element
        bytes_accessed=(B * (2 * S * C + C * P) * in_bytes   # f, ft, w in
                        + B * C * P * 4),                    # f32 out
    )

    kernel = functools.partial(_attn_pool_kernel, approx_recip=not exact)

    return pl.pallas_call(
        kernel,
        out_shape=jax.ShapeDtypeStruct((B, C, P), jnp.float32),
        grid_spec=pltpu.PrefetchScalarGridSpec(
            num_scalar_prefetch=0,
            grid=grid,
            in_specs=[
                pl.BlockSpec((bb, S, C), lambda b: (b, 0, 0)),
                pl.BlockSpec((bb, C, S), lambda b: (b, 0, 0)),
                pl.BlockSpec((bb, C, P), lambda b: (b, 0, 0)),
            ],
            out_specs=pl.BlockSpec((bb, C, P), lambda b: (b, 0, 0)),
        ),
        compiler_params=pltpu.CompilerParams(
            dimension_semantics=("parallel",),
            allow_input_fusion=[True, True, True],
        ),
        cost_estimate=cost,
    )(f, ft, w)


def _reference(features, weights):
    # Pure-JAX transcription of the PyTorch forward, for verification.
    f = features[..., None].astype(jnp.float32)            # (B, C, H, W, 1)
    w = weights[:, :, None, None, :].astype(jnp.float32)   # (B, C, 1, 1, P)
    att_num = jax.nn.softplus((f * w).sum(1)) + CONST      # (B, H, W, P)
    att_denom = att_num.sum(2).sum(1)                      # (B, P)
    att = att_num / att_denom[:, None, None, :]            # (B, H, W, P)
    return (att[:, None] * f).sum(3).sum(2)                # (B, C, P)


if __name__ == "__main__":
    # Shapes consistent with the module's docstring: features (B, 256, 4, 4),
    # per-class attention weights (B, 256, num_classes).
    B, C, H, W, P = 2, 256, 4, 4, 128

    key = jax.random.PRNGKey(0)
    kf, kw = jax.random.split(key)
    features = jax.random.normal(kf, (B, C, H, W), dtype=jnp.float32)
    weights = jax.random.normal(kw, (B, C, P), dtype=jnp.float32) * 0.1

    ref = _reference(features, weights)

    # Default (fast) path: bf16 inputs, f32 accumulation / softmax-style math,
    # f32 second matmul and output.
    out_bf16 = jax.block_until_ready(attentional_pooling(features, weights))
    assert out_bf16.shape == (B, C, P), out_bf16.shape
    assert jnp.allclose(out_bf16, ref, atol=5e-2, rtol=5e-2), (
        float(jnp.max(jnp.abs(out_bf16 - ref))))

    # Exact f32 path matches the reference to tight tolerance.
    out_f32 = jax.block_until_ready(
        attentional_pooling(features, weights, mm_dtype=jnp.float32))
    assert out_f32.shape == (B, C, P), out_f32.shape
    assert jnp.allclose(out_f32, ref, atol=1e-4, rtol=1e-4), (
        float(jnp.max(jnp.abs(out_f32 - ref))))

    print("KERNEL_OK")
</pallas_src>

<mosaic_0001>
module attributes {stable_mosaic.version = 11 : i64} {
  func.func @_attn_pool_kernel(%arg0: i32, %arg1: memref<2x16x256xbf16, #tpu.memory_space<vmem>>, %arg2: memref<2x256x16xbf16, #tpu.memory_space<vmem>>, %arg3: memref<2x256x128xbf16, #tpu.memory_space<vmem>>, %arg4: memref<2x256x128xf32, #tpu.memory_space<vmem>>) attributes {dimension_semantics = [#tpu.dimension_semantics<parallel>], iteration_bounds = array<i64: 1>, scalar_prefetch = 0 : i64, scratch_operands = 0 : i64, tpu.core_type = #tpu.core_type<tc>, window_params = [{transform_indices = @transform_0, window_bounds = array<i64: 2, 16, 256>}, {transform_indices = @transform_1, window_bounds = array<i64: 2, 256, 16>}, {transform_indices = @transform_2, window_bounds = array<i64: 2, 256, 128>}, {transform_indices = @transform_3, window_bounds = array<i64: 2, 256, 128>}]} {
    %c0 = arith.constant 0 : index
    %c0_0 = arith.constant 0 : index
    %c0_1 = arith.constant 0 : index
    %0 = vector.load %arg1[%c0, %c0_0, %c0_1] : memref<2x16x256xbf16, #tpu.memory_space<vmem>>, vector<2x16x256xbf16>
    %c0_2 = arith.constant 0 : index
    %c0_3 = arith.constant 0 : index
    %c0_4 = arith.constant 0 : index
    %1 = vector.load %arg3[%c0_2, %c0_3, %c0_4] : memref<2x256x128xbf16, #tpu.memory_space<vmem>>, vector<2x256x128xbf16>
    "tpu.trace_start"() <{level = 10 : i32, message = "bsc,bcp->bsp"}> : () -> ()
    %cst = arith.constant dense<0.000000e+00> : vector<2x16x128xf32>
    %2 = tpu.matmul %0, %1, %cst {dimension_numbers = #tpu.dot_dimension_numbers<[2], [1], [1], [2], [0, 0, 0, 1, 1, 2], [0], [0]>} : vector<2x16x256xbf16>, vector<2x256x128xbf16>, vector<2x16x128xf32> -> vector<2x16x128xf32>
    "tpu.trace_stop"() : () -> ()
    %3 = math.absf %2 : vector<2x16x128xf32>
    %cst_5 = arith.constant 0.000000e+00 : f32
    %4 = vector.broadcast %cst_5 : f32 to vector<2x16x128xf32>
    %5 = arith.subf %4, %3 : vector<2x16x128xf32>
    %6 = math.exp %5 : vector<2x16x128xf32>
    %7 = math.log1p %6 : vector<2x16x128xf32>
    %cst_6 = arith.constant 0.000000e+00 : f32
    %8 = vector.broadcast %cst_6 : f32 to vector<2x16x128xf32>
    %9 = arith.maximumf %2, %8 : vector<2x16x128xf32>
    %10 = arith.addf %7, %9 : vector<2x16x128xf32>
    %cst_7 = arith.constant 9.99999974E-5 : f32
    %11 = vector.broadcast %cst_7 : f32 to vector<2x16x128xf32>
    %12 = arith.addf %10, %11 : vector<2x16x128xf32>
    %cst_8 = arith.constant dense<0.000000e+00> : vector<2x128xf32>
    %13 = vector.multi_reduction <add>, %12, %cst_8 [1] : vector<2x16x128xf32> to vector<2x128xf32>
    %14 = vector.shape_cast %13 : vector<2x128xf32> to vector<2x1x128xf32>
    %15 = tpu.reciprocal %14 {approx = true} : vector<2x1x128xf32> -> vector<2x1x128xf32>
    %16 = vector.broadcast %15 : vector<2x1x128xf32> to vector<2x16x128xf32>
    %17 = arith.mulf %12, %16 : vector<2x16x128xf32>
    %c0_9 = arith.constant 0 : index
    %c0_10 = arith.constant 0 : index
    %c0_11 = arith.constant 0 : index
    %18 = vector.load %arg2[%c0_9, %c0_10, %c0_11] : memref<2x256x16xbf16, #tpu.memory_space<vmem>>, vector<2x256x16xbf16>
    %19 = arith.extf %18 : vector<2x256x16xbf16> to vector<2x256x16xf32>
    "tpu.trace_start"() <{level = 10 : i32, message = "bcs,bsp->bcp"}> : () -> ()
    %cst_12 = arith.constant dense<0.000000e+00> : vector<2x256x128xf32>
    %20 = tpu.matmul %19, %17, %cst_12 {dimension_numbers = #tpu.dot_dimension_numbers<[2], [1], [1], [2], [0, 0, 0, 1, 1, 2], [0], [0]>} : vector<2x256x16xf32>, vector<2x16x128xf32>, vector<2x256x128xf32> -> vector<2x256x128xf32>
    "tpu.trace_stop"() : () -> ()
    %c0_13 = arith.constant 0 : index
    %c0_14 = arith.constant 0 : index
    %c0_15 = arith.constant 0 : index
    %21 = vector.load %arg4[%c0_13, %c0_14, %c0_15] : memref<2x256x128xf32, #tpu.memory_space<vmem>>, vector<2x256x128xf32>
    tpu.vector_store %arg4[%c0_13, %c0_14, %c0_15], %20 {strides = array<i32>} : memref<2x256x128xf32, #tpu.memory_space<vmem>>, vector<2x256x128xf32>,
    return
  }
  func.func @transform_0(%arg0: i32) -> (i32, i32, i32) {
    %c0_i32 = arith.constant 0 : i32
    %c0_i32_0 = arith.constant 0 : i32
    %c0_i32_1 = arith.constant 0 : i32
    return %arg0, %c0_i32, %c0_i32_0 : i32, i32, i32
  }
  func.func @transform_1(%arg0: i32) -> (i32, i32, i32) {
    %c0_i32 = arith.constant 0 : i32
    %c0_i32_0 = arith.constant 0 : i32
    %c0_i32_1 = arith.constant 0 : i32
    return %arg0, %c0_i32, %c0_i32_0 : i32, i32, i32
  }
  func.func @transform_2(%arg0: i32) -> (i32, i32, i32) {
    %c0_i32 = arith.constant 0 : i32
    %c0_i32_0 = arith.constant 0 : i32
    %c0_i32_1 = arith.constant 0 : i32
    return %arg0, %c0_i32, %c0_i32_0 : i32, i32, i32
  }
  func.func @transform_3(%arg0: i32) -> (i32, i32, i32) {
    %c0_i32 = arith.constant 0 : i32
    %c0_i32_0 = arith.constant 0 : i32
    %c0_i32_1 = arith.constant 0 : i32
    return %arg0, %c0_i32, %c0_i32_0 : i32, i32, i32
  }
}

</mosaic_0001>

<bundles_post_ra>
// kernel: tpu_custom_call.1
= control target key start
LH: loop header
LB: loop body
LE: loop exit
PB: predicated region body
PF: predicated region fallthrough
CT: control target
= control target key end

     0   :  { %s1830_s0 = inlined_call_operand.vmem [shape: bf16[2,16,256], index: 0, kind: input, shape index: {}]   ;;  %s1831_s1 = inlined_call_operand.vmem [shape: bf16[2,256,16], index: 1, kind: input, shape index: {}]   ;;  %s1832_s2 = inlined_call_operand.vmem [shape: bf16[2,256,128], index: 2, kind: input, shape index: {}]   ;;  %s1833_s3 = inlined_call_operand.hbm [shape: f32[2,256,128], index: 3, kind: output, shape index: {}]  }
   0x1   :  { %v1283_v0 = vld [vmem:[%s1832_s2 + $0x38] sm:$0xff]  ;;  %v1282_v4 = vld [vmem:[%s1832_s2 + $0x30] sm:$0xff]  ;;  %v1281_v8 = vld [vmem:[%s1832_s2 + $0x28] sm:$0xff] }
   0x2   :  { %v1291_v1 = vld [vmem:[%s1832_s2 + $0x78] sm:$0xff]  ;;  %189 = vmatpush.bf16.msra.mxu0 %v1283_v0  ;;  %v1290_v5 = vld [vmem:[%s1832_s2 + $0x70] sm:$0xff]  ;;  %v1289_v9 = vld [vmem:[%s1832_s2 + $0x68] sm:$0xff] }
   0x3   :  { %v1299_v2 = vld [vmem:[%s1832_s2 + $0xb8] sm:$0xff]  ;;  %203 = vmatpush.bf16.msra.mxu1 %v1291_v1  ;;  %v1298_v6 = vld [vmem:[%s1832_s2 + $0xb0] sm:$0xff]  ;;  %v1297_v10 = vld [vmem:[%s1832_s2 + $0xa8] sm:$0xff] }
   0x4   :  { %v1307_v3 = vld [vmem:[%s1832_s2 + $0xf8] sm:$0xff]  ;;  %323 = vmatpush.bf16.msra.mxu2 %v1299_v2  ;;  %v1306_v7 = vld [vmem:[%s1832_s2 + $0xf0] sm:$0xff]  ;;  %v1305_v11 = vld [vmem:[%s1832_s2 + $0xe8] sm:$0xff] }
   0x5   :  { %337 = vmatpush.bf16.msra.mxu3 %v1307_v3  ;;  %v1280_v12 = vld [vmem:[%s1832_s2 + $0x20] sm:$0xff] }
   0x6   :  { %190 = vmatpush.bf16.msra.mxu0 %v1282_v4  ;;  %v1288_v13 = vld [vmem:[%s1832_s2 + $0x60] sm:$0xff] }
   0x7   :  { %204 = vmatpush.bf16.msra.mxu1 %v1290_v5  ;;  %v1296_v14 = vld [vmem:[%s1832_s2 + $0xa0] sm:$0xff] }
   0x8   :  { %324 = vmatpush.bf16.msra.mxu2 %v1298_v6  ;;  %v1304_v15 = vld [vmem:[%s1832_s2 + $0xe0] sm:$0xff] }
   0x9   :  { %338 = vmatpush.bf16.msra.mxu3 %v1306_v7 }
   0xa   :  { %191 = vmatpush.bf16.msra.mxu0 %v1281_v8 }
   0xb   :  { %205 = vmatpush.bf16.msra.mxu1 %v1289_v9 }
   0xc   :  { %325 = vmatpush.bf16.msra.mxu2 %v1297_v10 }
   0xd   :  { %339 = vmatpush.bf16.msra.mxu3 %v1305_v11 }
   0xe   :  { %8 = vsyncpa [#allocation3], 0  ;;  %192 = vmatpush.bf16.msra.mxu0 %v1280_v12  ;;  %v1279_v16 = vld [vmem:[%s1832_s2 + $0x18] sm:$0xff]  ;;  %v1278_v20 = vld [vmem:[%s1832_s2 + $0x10] sm:$0xff]  ;;  %vm563_vm4 = vcmask 130048   ;;  %s1052_s18 = sshll.u32 %s1833_s3, 4  ;;  %s1053_s18 = int_to_ptr.hbm [resolvable:$true] %s1052_s18 }
   0xf   :  { %206 = vmatpush.bf16.msra.mxu1 %v1288_v13  ;;  %v1287_v17 = vld [vmem:[%s1832_s2 + $0x58] sm:$0xff]  ;;  %v1286_v21 = vld [vmem:[%s1832_s2 + $0x50] sm:$0xff]  ;;  %v1277_v24 = vld [vmem:[%s1832_s2 + $0x8] sm:$0xff]  ;;  %s1521_s19 = smov 128   ;;  %s1522_s20 = smov 8  }
  0x10   :  { %326 = vmatpush.bf16.msra.mxu2 %v1296_v14  ;;  %v1295_v18 = vld [vmem:[%s1832_s2 + $0x98] sm:$0xff]  ;;  %v1294_v22 = vld [vmem:[%s1832_s2 + $0x90] sm:$0xff]  ;;  %v1285_v25 = vld [vmem:[%s1832_s2 + $0x48] sm:$0xff] }
  0x11   :  { %340 = vmatpush.bf16.msra.mxu3 %v1304_v15  ;;  %v1303_v19 = vld [vmem:[%s1832_s2 + $0xd8] sm:$0xff]  ;;  %v1302_v23 = vld [vmem:[%s1832_s2 + $0xd0] sm:$0xff]  ;;  %v1293_v26 = vld [vmem:[%s1832_s2 + $0x88] sm:$0xff] }
  0x12   :  { %193 = vmatpush.bf16.msra.mxu0 %v1279_v16  ;;  %v1301_v27 = vld [vmem:[%s1832_s2 + $0xc8] sm:$0xff]  ;;  %v1276_v28 = vld [vmem:[%s1832_s2] sm:$0xff]  ;;  %v1138_v36 = vld [vmem:[%s1830_s0 + $0x10] sm:$0xf] }
  0x13   :  { %207 = vmatpush.bf16.msra.mxu1 %v1287_v17  ;;  %v1284_v29 = vld [vmem:[%s1832_s2 + $0x40] sm:$0xff]  ;;  %v1273_v33 = vld [vmem:[%s1830_s0 + $0x4] sm:$0xf0]  ;;  %v1068_v35 = vld [vmem:[%s1830_s0 + $0x8] sm:$0xf0] }
  0x14   :  { %327 = vmatpush.bf16.msra.mxu2 %v1295_v18  ;;  %v1292_v30 = vld [vmem:[%s1832_s2 + $0x80] sm:$0xff]  ;;  %v1275_v37 = vld [vmem:[%s1830_s0 + $0x14] sm:$0xf0]  ;;  %v1274_v38 = vld [vmem:[%s1830_s0 + $0x14] sm:$0xf] }
  0x15   :  { %341 = vmatpush.bf16.msra.mxu3 %v1303_v19  ;;  %v1300_v31 = vld [vmem:[%s1832_s2 + $0xc0] sm:$0xff]  ;;  %v1140_v39 = vld [vmem:[%s1830_s0 + $0x18] sm:$0xf0]  ;;  %v1139_v42 = vor.u32 %v1275_v37, %v1138_v36 }
  0x16   :  { %194 = vmatpush.bf16.msra.mxu0 %v1278_v20  ;;  %v1066_v32 = vld [vmem:[%s1830_s0] sm:$0xf]  ;;  %v1272_v34 = vld [vmem:[%s1830_s0 + $0x4] sm:$0xf]  ;;  %v1143_v43 = vor.u32 %v1274_v38, %v1140_v39 }
  0x17   :  { %208 = vmatpush.bf16.msra.mxu1 %v1286_v21  ;;  %v1067_v40 = vor.u32 %v1273_v33, %v1066_v32  ;;  %v1071_v41 = vor.u32 %v1272_v34, %v1068_v35 }
  0x18   :  { %328 = vmatpush.bf16.msra.mxu2 %v1294_v22 }
  0x19   :  { %342 = vmatpush.bf16.msra.mxu3 %v1302_v23 }
  0x1a   :  { %195 = vmatpush.bf16.msra.mxu0 %v1277_v24 }
  0x1b   :  { %209 = vmatpush.bf16.msra.mxu1 %v1285_v25 }
  0x1c   :  { %329 = vmatpush.bf16.msra.mxu2 %v1293_v26 }
  0x1d   :  { %343 = vmatpush.bf16.msra.mxu3 %v1301_v27 }
  0x1e   :  { %196 = vmatpush.bf16.msra.mxu0 %v1276_v28 }
  0x1f   :  { %210 = vmatpush.bf16.msra.mxu1 %v1284_v29 }
  0x20   :  { %330 = vmatpush.bf16.msra.mxu2 %v1292_v30 }
  0x21   :  { %344 = vmatpush.bf16.msra.mxu3 %v1300_v31  ;;  %197 = vmatmul.bf16.vlgmr.msra.gmra.mxu0 %v1067_v40 }
  0x22   :  { %211 = vmatmul.bf16.vlgmr.msra.gmra.mxu1 %v1071_v41 }
  0x23   :  { %331 = vmatmul.bf16.vlgmr.msra.gmra.mxu2 %v1139_v42 }
  0x24   :  { %345 = vmatmul.bf16.vlgmr.msra.gmra.mxu3 %v1143_v43 }
  0x9e   :  { %v198_v44 = vpop.f32.mrf.mxu0 }
  0x9f   :  { %v212_v45 = vpop.f32.mrf.mxu1 }
  0xa0   :  { %v213_v46 = vadd.f32 %v212_v45, %v198_v44 }
  0xa2   :  { %v351_v47 = vand.u32 2147483647, %v213_v46  ;;  %v403_v24 = vmax.f32 %v213_v46, 0.0 }
  0xa4   :  { %v355_v48 = vsub.f32 0.0, %v351_v47 }
  0xa6   :  { %v359_v49 = vmul.f32 1.442695, %v355_v48  ;;  %v332_v50 = vpop.f32.mrf.mxu2  ;;  %v200_v53 = vpop.f32.mrf.mxu0 }
  0xa7   :  { %v346_v51 = vpop.f32.mrf.mxu3  ;;  %v214_v54 = vpop.f32.mrf.mxu1 }
  0xa8   :  { %v1663_v52 = vadd.f32 %v346_v51, %v332_v50  ;;  %1474 = vpow2.f32 %v359_v49  ;;  %v215_v55 = vadd.f32 %v214_v54, %v200_v53 }
  0xaa   :  { %v353_v56 = vand.u32 2147483647, %v1663_v52  ;;  %v352_v57 = vand.u32 2147483647, %v215_v55  ;;  %v404_v32 = vmax.f32 %v215_v55, 0.0  ;;  %v405_v43 = vmax.f32 %v1663_v52, 0.0 }
  0xac   :  { %v357_v58 = vsub.f32 0.0, %v353_v56  ;;  %v356_v59 = vsub.f32 0.0, %v352_v57 }
  0xae   :  { %v363_v60 = vmul.f32 1.442695, %v357_v58  ;;  %v1475_v61 = vpop.eup %1474  ;;  %v361_v62 = vmul.f32 1.442695, %v356_v59  ;;  %v334_v63 = vpop.f32.mrf.mxu2 }
  0xaf   :  { %v348_v0 = vpop.f32.mrf.mxu3  ;;  %v367_v1 = vadd.f32 1.0, %v1475_v61  ;;  %v370_v6 = vmul.f32 -0.5, %v1475_v61  ;;  %v373_v14 = vand.u32 2147483647, %v1475_v61 }
  0xb0   :  { %1476 = vpow2.f32 %v363_v60  ;;  %v349_v2 = vadd.f32 %v348_v0, %v334_v63 }
  0xb1   :  { %1478 = vpow2.f32 %v361_v62  ;;  %v371_v12 = vadd.f32 1.0, %v370_v6  ;;  %vm374_vm0 = vcmp.lt.f32.partialorder %v373_v14, 0.0004427343 }
  0xb2   :  { %1480 = vlog2.f32 %v367_v1  ;;  %v354_v3 = vand.u32 2147483647, %v349_v2  ;;  %v406_v48 = vmax.f32 %v349_v2, 0.0  ;;  %v1443_v1 = vld [vmem:[%s1831_s1 + $0x40] sm:$0xff]  }
  0xb3   :  { %v372_v16 = vmul.f32 %v1475_v61, %v371_v12  ;;  %v1309_v2 = vld [vmem:[%s1831_s1] sm:$0xff]   ;;  %v1342_v6 = vunpack.c.l.bf16 %v1443_v1 }
  0xb4   :  { %v358_v4 = vsub.f32 0.0, %v354_v3 }
  0xb6   :  { %v1477_v5 = vpop.eup %1476  ;;  %v365_v9 = vmul.f32 1.442695, %v358_v4 }
  0xb7   :  { %v1479_v7 = vpop.eup %1478  ;;  %v385_v8 = vadd.f32 1.0, %v1477_v5  ;;  %v388_v17 = vmul.f32 -0.5, %v1477_v5  ;;  %v391_v25 = vand.u32 2147483647, %v1477_v5 }
  0xb8   :  { %v376_v10 = vadd.f32 1.0, %v1479_v7  ;;  %v1481_v11 = vpop.eup %1480  ;;  %v379_v13 = vmul.f32 -0.5, %v1479_v7  ;;  %v382_v20 = vand.u32 2147483647, %v1479_v7 }
  0xb9   :  { %1482 = vlog2.f32 %v385_v8  ;;  %v369_v15 = vmul.f32 0.6931472, %v1481_v11  ;;  %v389_v27 = vadd.f32 1.0, %v388_v17  ;;  %vm392_vm2 = vcmp.lt.f32.partialorder %v391_v25, 0.0004427343  ;;  %v1452_v25 = vld [vmem:[%s1831_s1 + $0x88] sm:$0xff]  }
  0xba   :  { %1484 = vpow2.f32 %v365_v9  ;;  %v380_v18 = vadd.f32 1.0, %v379_v13  ;;  %vm383_vm1 = vcmp.lt.f32.partialorder %v382_v20, 0.0004427343  ;;  %v1459_v9 = vld [vmem:[%s1831_s1 + $0xc0] sm:$0xff]   ;;  %v1311_v17 = vunpack.c.h.bf16 %v1309_v2 }
  0xbb   :  { %1486 = vlog2.f32 %v376_v10  ;;  %v375_v22 = vsel %vm374_vm0, %v372_v16, %v369_v15  ;;  %v390_v36 = vmul.f32 %v1477_v5, %v389_v27  ;;  %v1451_v10 = vld [vmem:[%s1831_s1 + $0x80] sm:$0xff]   ;;  %v1406_v13 = vunpack.c.l.bf16 %v1459_v9 }
  0xbc   :  { %v381_v29 = vmul.f32 %v1479_v7, %v380_v18  ;;  %v407_v31 = vadd.f32 %v403_v24, %v375_v22  ;;  %v1310_v7 = vunpack.c.l.bf16 %v1309_v2  ;;  %v1374_v14 = vunpack.c.l.bf16 %v1451_v10  ;;  %v1444_v18 = vld [vmem:[%s1831_s1 + $0x48] sm:$0xff]  }
  0xbd   :  { %v1343_v16 = vunpack.c.h.bf16 %v1443_v1  ;;  %v1407_v20 = vunpack.c.h.bf16 %v1459_v9  ;;  %v1346_v22 = vunpack.c.l.bf16 %v1444_v18  ;;  %v1460_v24 = vld [vmem:[%s1831_s1 + $0xc8] sm:$0xff]   ;;  %v1378_v27 = vunpack.c.l.bf16 %v1452_v25 }
  0xbe   :  { %v411_v38 = vadd.f32 0.0001, %v407_v31  ;;  %v1437_v31 = vld [vmem:[%s1831_s1 + $0x10] sm:$0xff]   ;;  %v1448_v2 = vld [vmem:[%s1831_s1 + $0x68] sm:$0xff]  }
  0xbf   :  { %v1483_v19 = vpop.eup %1482  ;;  %v1456_v9 = vld [vmem:[%s1831_s1 + $0xa8] sm:$0xff]  }
  0xc0   :  { %v1485_v21 = vpop.eup %1484  ;;  %v387_v33 = vmul.f32 0.6931472, %v1483_v19  ;;  %v1436_v19 = vld [vmem:[%s1831_s1 + $0x8] sm:$0xff]  }
  0xc1   :  { %v1487_v23 = vpop.eup %1486  ;;  %v394_v26 = vadd.f32 1.0, %v1485_v21  ;;  %v397_v30 = vmul.f32 -0.5, %v1485_v21  ;;  %v400_v40 = vand.u32 2147483647, %v1485_v21 }
  0xc2   :  { %v378_v28 = vmul.f32 0.6931472, %v1487_v23  ;;  %v393_v41 = vsel %vm392_vm2, %v390_v36, %v387_v33  ;;  %v1314_v23 = vunpack.c.l.bf16 %v1436_v19  ;;  %v1379_v33 = vunpack.c.h.bf16 %v1452_v25  ;;  %v1461_v36 = vld [vmem:[%s1831_s1 + $0xd0] sm:$0xff]  }
  0xc3   :  { %1488 = vlog2.f32 %v394_v26  ;;  %v398_v37 = vadd.f32 1.0, %v397_v30  ;;  %v409_v47 = vadd.f32 %v405_v43, %v393_v41  ;;  %vm401_vm3 = vcmp.lt.f32.partialorder %v400_v40, 0.0004427343  ;;  %v1445_v30 = vld [vmem:[%s1831_s1 + $0x50] sm:$0xff]   ;;  %v1438_v43 = vld [vmem:[%s1831_s1 + $0x18] sm:$0xff]  }
  0xc4   :  { %v384_v34 = vsel %vm383_vm1, %v381_v29, %v378_v28  ;;  %v1410_v26 = vunpack.c.l.bf16 %v1460_v24  ;;  %v1347_v28 = vunpack.c.h.bf16 %v1444_v18  ;;  %v1315_v29 = vunpack.c.h.bf16 %v1436_v19 }
  0xc5   :  { %v408_v35 = vadd.f32 %v404_v32, %v384_v34  ;;  %v399_v46 = vmul.f32 %v1485_v21, %v398_v37  ;;  %v413_v54 = vadd.f32 0.0001, %v409_v47  ;;  %v1375_v21 = vunpack.c.h.bf16 %v1451_v10  ;;  %v1453_v37 = vld [vmem:[%s1831_s1 + $0x90] sm:$0xff]  }
  0xc6   :  { %v1411_v32 = vunpack.c.h.bf16 %v1460_v24  ;;  %v1350_v34 = vunpack.c.l.bf16 %v1445_v30  ;;  %v1351_v40 = vunpack.c.h.bf16 %v1445_v30  ;;  %v1319_v41 = vunpack.c.h.bf16 %v1437_v31 }
  0xc7   :  { %v412_v39 = vadd.f32 0.0001, %v408_v35  ;;  %v1318_v35 = vunpack.c.l.bf16 %v1437_v31  ;;  %v1322_v47 = vunpack.c.l.bf16 %v1438_v43 }
  0xc9   :  { %v1489_v42 = vpop.eup %1488  ;;  %v415_v44 = vadd.f32 %v412_v39, %v411_v38 }
  0xca   :  { %v396_v45 = vmul.f32 0.6931472, %v1489_v42  ;;  %v1446_v42 = vld [vmem:[%s1831_s1 + $0x58] sm:$0xff]  }
  0xcb   :  { %v416_v49 = vrot.slane %v415_v44, 4 }
  0xcc   :  { %v402_v50 = vsel %vm401_vm3, %v399_v46, %v396_v45  ;;  %v1383_v45 = vunpack.c.h.bf16 %v1453_v37  ;;  %v1354_v46 = vunpack.c.l.bf16 %v1446_v42 }
  0xcd   :  { %v417_v51 = vadd.f32 %v416_v49, %v415_v44  ;;  %v410_v53 = vadd.f32 %v406_v48, %v402_v50  ;;  %v1415_v44 = vunpack.c.h.bf16 %v1461_v36  ;;  %v1462_v48 = vld [vmem:[%s1831_s1 + $0xd8] sm:$0xff]  }
  0xce   :  { %v1454_v49 = vld [vmem:[%s1831_s1 + $0x98] sm:$0xff]   ;;  %v1418_v50 = vunpack.c.l.bf16 %v1462_v48 }
  0xcf   :  { %v418_v55 = vrot.slane %v417_v51, 2  ;;  %v414_v56 = vadd.f32 0.0001, %v410_v53  ;;  %v1355_v53 = vunpack.c.h.bf16 %v1446_v42 }
  0xd1   :  { %v419_v57 = vadd.f32 %v418_v55, %v417_v51  ;;  %v422_v58 = vadd.f32 %v414_v56, %v413_v54  ;;  %v1386_v51 = vunpack.c.l.bf16 %v1454_v49  ;;  %v1447_v55 = vld [vmem:[%s1831_s1 + $0x60] sm:$0xff]  }
  0xd3   :  { %v420_v59 = vrot.slane %v419_v57, 1  ;;  %v423_v60 = vrot.slane %v422_v58, 4 }
  0xd5   :  { %v421_v61 = vadd.f32 %v420_v59, %v419_v57  ;;  %v424_v62 = vadd.f32 %v423_v60, %v422_v58  ;;  %v1419_v57 = vunpack.c.h.bf16 %v1462_v48  ;;  %v1387_v58 = vunpack.c.h.bf16 %v1454_v49 }
  0xd6   :  { %v1358_v59 = vunpack.c.l.bf16 %v1447_v55 }
  0xd7   :  { %1490 = vrcp.f32 %v421_v61  ;;  %v425_v52 = vrot.slane %v424_v62, 2  ;;  %v1463_v61 = vld [vmem:[%s1831_s1 + $0xe0] sm:$0xff]  }
  0xd9   :  { %v426_v63 = vadd.f32 %v425_v52, %v424_v62  ;;  %v1455_v62 = vld [vmem:[%s1831_s1 + $0xa0] sm:$0xff]   ;;  %v1422_v52 = vunpack.c.l.bf16 %v1463_v61 }
  0xdb   :  { %v427_v0 = vrot.slane %v426_v63, 1 }
  0xdd   :  { %v1491_v3 = vpop.eup %1490  ;;  %v428_v4 = vadd.f32 %v427_v0, %v426_v63  ;;  %v1390_v63 = vunpack.c.l.bf16 %v1455_v62  ;;  %v1359_v0 = vunpack.c.h.bf16 %v1447_v55 }
  0xde   :  { %v432_v5 = vmul.f32 %v1491_v3, %v412_v39  ;;  %v431_v8 = vmul.f32 %v1491_v3, %v411_v38  ;;  %v1414_v38 = vunpack.c.l.bf16 %v1461_v36  ;;  %v1382_v39 = vunpack.c.l.bf16 %v1453_v37  ;;  %v1440_v3 = vld [vmem:[%s1831_s1 + $0x28] sm:$0xff]  }
  0xdf   :  { %1492 = vrcp.f32 %v428_v4  ;;  %v1423_v4 = vunpack.c.h.bf16 %v1463_v61 }
  0xe0   :  { %674 = vmatpush.msrb.mxu0 %v432_v5  ;;  %1467 = vmatpush.msrb.mxu2 %v432_v5  ;;  %v1391_v5 = vunpack.c.h.bf16 %v1455_v62 }
  0xe2   :  { %675 = vmatpush.msrb.mxu0 %v431_v8  ;;  %1468 = vmatpush.msrb.mxu2 %v431_v8  ;;  %v1464_v8 = vld [vmem:[%s1831_s1 + $0xe8] sm:$0xff]  }
  0xe3   :  { %1224 = vmatmul.msk.f32.vlgmr.msrb.gmra.mxu2 %vm563_vm4, %v1342_v6  ;;  %1208 = vmatmul.msk.f32.vlgmr.msrb.gmra.mxu0 %vm563_vm4, %v1310_v7  ;;  %v1362_v6 = vunpack.c.l.bf16 %v1448_v2  ;;  %v1330_v7 = vunpack.c.l.bf16 %v1440_v3  ;;  %v1426_v10 = vunpack.c.l.bf16 %v1464_v8 }
  0xe5   :  { %v1493_v11 = vpop.eup %1492 }
  0xe6   :  { %v434_v12 = vmul.f32 %v1493_v11, %v414_v56  ;;  %v433_v15 = vmul.f32 %v1493_v11, %v413_v54  ;;  %v1323_v54 = vunpack.c.h.bf16 %v1438_v43  ;;  %v1439_v56 = vld [vmem:[%s1831_s1 + $0x20] sm:$0xff]   ;;  %v1394_v11 = vunpack.c.l.bf16 %v1456_v9 }
  0xe7   :  { %v1326_v60 = vunpack.c.l.bf16 %v1439_v56  ;;  %v1327_v1 = vunpack.c.h.bf16 %v1439_v56 }
  0xe8   :  { %883 = vmatpush.msrb.mxu1 %v434_v12  ;;  %1469 = vmatpush.msrb.mxu3 %v434_v12  ;;  %v1363_v12 = vunpack.c.h.bf16 %v1448_v2 }
  0xea   :  { %884 = vmatpush.msrb.mxu1 %v433_v15  ;;  %1470 = vmatpush.msrb.mxu3 %v433_v15  ;;  %v1441_v15 = vld [vmem:[%s1831_s1 + $0x30] sm:$0xff]  }
  0xeb   :  { %1256 = vmatmul.msk.f32.vlgmr.msrb.gmra.mxu3 %vm563_vm4, %v1406_v13  ;;  %1240 = vmatmul.msk.f32.vlgmr.msrb.gmra.mxu1 %vm563_vm4, %v1374_v14  ;;  %v1331_v13 = vunpack.c.h.bf16 %v1440_v3  ;;  %v1449_v14 = vld [vmem:[%s1831_s1 + $0x70] sm:$0xff]   ;;  %v1334_v19 = vunpack.c.l.bf16 %v1441_v15  ;;  %v1335_v25 = vunpack.c.h.bf16 %v1441_v15 }
  0xec   :  { %1225 = vmatmul.msk.f32.gmra.mxu2 %vm563_vm4, %v1343_v16  ;;  %1209 = vmatmul.msk.f32.gmra.mxu0 %vm563_vm4, %v1311_v17  ;;  %v1427_v16 = vunpack.c.h.bf16 %v1464_v8  ;;  %v1395_v17 = vunpack.c.h.bf16 %v1456_v9  ;;  %v1366_v18 = vunpack.c.l.bf16 %v1449_v14  ;;  %v1367_v24 = vunpack.c.h.bf16 %v1449_v14 }
  0xf3   :  { %1257 = vmatmul.msk.f32.gmra.mxu3 %vm563_vm4, %v1407_v20  ;;  %1241 = vmatmul.msk.f32.gmra.mxu1 %vm563_vm4, %v1375_v21  ;;  %v1465_v20 = vld [vmem:[%s1831_s1 + $0xf0] sm:$0xff]  }
  0xf4   :  { %1226 = vmatmul.msk.f32.gmra.mxu2 %vm563_vm4, %v1346_v22  ;;  %1210 = vmatmul.msk.f32.gmra.mxu0 %vm563_vm4, %v1314_v23  ;;  %v1457_v21 = vld [vmem:[%s1831_s1 + $0xb0] sm:$0xff]   ;;  %v1430_v22 = vunpack.c.l.bf16 %v1465_v20 }
  0xf5   :  { %v1398_v23 = vunpack.c.l.bf16 %v1457_v21 }
  0xfb   :  { %1258 = vmatmul.msk.f32.gmra.mxu3 %vm563_vm4, %v1410_v26  ;;  %1242 = vmatmul.msk.f32.gmra.mxu1 %vm563_vm4, %v1378_v27  ;;  %v1450_v26 = vld [vmem:[%s1831_s1 + $0x78] sm:$0xff]  }
  0xfc   :  { %1227 = vmatmul.msk.f32.gmra.mxu2 %vm563_vm4, %v1347_v28  ;;  %1211 = vmatmul.msk.f32.gmra.mxu0 %vm563_vm4, %v1315_v29  ;;  %v1442_v27 = vld [vmem:[%s1831_s1 + $0x38] sm:$0xff]   ;;  %v1431_v28 = vunpack.c.h.bf16 %v1465_v20  ;;  %v1399_v29 = vunpack.c.h.bf16 %v1457_v21  ;;  %v1370_v30 = vunpack.c.l.bf16 %v1450_v26  ;;  %v1371_v36 = vunpack.c.h.bf16 %v1450_v26 }
  0xfd   :  { %v1338_v31 = vunpack.c.l.bf16 %v1442_v27  ;;  %v1339_v37 = vunpack.c.h.bf16 %v1442_v27 }
 0x103   :  { %1259 = vmatmul.msk.f32.gmra.mxu3 %vm563_vm4, %v1411_v32  ;;  %1243 = vmatmul.msk.f32.gmra.mxu1 %vm563_vm4, %v1379_v33  ;;  %v1466_v32 = vld [vmem:[%s1831_s1 + $0xf8] sm:$0xff]  }
 0x104   :  { %1228 = vmatmul.msk.f32.gmra.mxu2 %vm563_vm4, %v1350_v34  ;;  %1212 = vmatmul.msk.f32.gmra.mxu0 %vm563_vm4, %v1318_v35  ;;  %v1458_v33 = vld [vmem:[%s1831_s1 + $0xb8] sm:$0xff]   ;;  %v1434_v34 = vunpack.c.l.bf16 %v1466_v32  ;;  %s1520_s1 = smov [#allocation2]  }
 0x105   :  { %v1402_v35 = vunpack.c.l.bf16 %v1458_v33  ;;  %s1050_s15 = sshll.u32 %s1520_s1, 4  ;;  %s1051_s15 = int_to_ptr.vmem [resolvable:$true] %s1050_s15 }
 0x10b   :  { %1260 = vmatmul.msk.f32.gmra.mxu3 %vm563_vm4, %v1414_v38  ;;  %1244 = vmatmul.msk.f32.gmra.mxu1 %vm563_vm4, %v1382_v39  ;;  %v1435_v38 = vunpack.c.h.bf16 %v1466_v32  ;;  %v1403_v39 = vunpack.c.h.bf16 %v1458_v33 }
 0x10c   :  { %1229 = vmatmul.msk.f32.gmra.mxu2 %vm563_vm4, %v1351_v40  ;;  %1213 = vmatmul.msk.f32.gmra.mxu0 %vm563_vm4, %v1319_v41 }
 0x113   :  { %1261 = vmatmul.msk.f32.gmra.mxu3 %vm563_vm4, %v1415_v44  ;;  %1245 = vmatmul.msk.f32.gmra.mxu1 %vm563_vm4, %v1383_v45 }
 0x114   :  { %1230 = vmatmul.msk.f32.gmra.mxu2 %vm563_vm4, %v1354_v46  ;;  %1214 = vmatmul.msk.f32.gmra.mxu0 %vm563_vm4, %v1322_v47 }
 0x11b   :  { %1262 = vmatmul.msk.f32.gmra.mxu3 %vm563_vm4, %v1418_v50  ;;  %1246 = vmatmul.msk.f32.gmra.mxu1 %vm563_vm4, %v1386_v51 }
 0x11c   :  { %1231 = vmatmul.msk.f32.gmra.mxu2 %vm563_vm4, %v1355_v53  ;;  %1215 = vmatmul.msk.f32.gmra.mxu0 %vm563_vm4, %v1323_v54 }
 0x123   :  { %1263 = vmatmul.msk.f32.gmra.mxu3 %vm563_vm4, %v1419_v57  ;;  %1247 = vmatmul.msk.f32.gmra.mxu1 %vm563_vm4, %v1387_v58 }
 0x124   :  { %1232 = vmatmul.msk.f32.gmra.mxu2 %vm563_vm4, %v1358_v59  ;;  %1216 = vmatmul.msk.f32.gmra.mxu0 %vm563_vm4, %v1326_v60 }
 0x12b   :  { %1264 = vmatmul.msk.f32.gmra.mxu3 %vm563_vm4, %v1422_v52  ;;  %1248 = vmatmul.msk.f32.gmra.mxu1 %vm563_vm4, %v1390_v63 }
 0x12c   :  { %1233 = vmatmul.msk.f32.gmra.mxu2 %vm563_vm4, %v1359_v0  ;;  %1217 = vmatmul.msk.f32.gmra.mxu0 %vm563_vm4, %v1327_v1 }
 0x133   :  { %1265 = vmatmul.msk.f32.gmra.mxu3 %vm563_vm4, %v1423_v4  ;;  %1249 = vmatmul.msk.f32.gmra.mxu1 %vm563_vm4, %v1391_v5 }
 0x134   :  { %1234 = vmatmul.msk.f32.gmra.mxu2 %vm563_vm4, %v1362_v6  ;;  %1218 = vmatmul.msk.f32.gmra.mxu0 %vm563_vm4, %v1330_v7 }
 0x13b   :  { %1266 = vmatmul.msk.f32.gmra.mxu3 %vm563_vm4, %v1426_v10  ;;  %1250 = vmatmul.msk.f32.gmra.mxu1 %vm563_vm4, %v1394_v11 }
 0x13c   :  { %1235 = vmatmul.msk.f32.gmra.mxu2 %vm563_vm4, %v1363_v12  ;;  %1219 = vmatmul.msk.f32.gmra.mxu0 %vm563_vm4, %v1331_v13 }
 0x143   :  { %1267 = vmatmul.msk.f32.gmra.mxu3 %vm563_vm4, %v1427_v16  ;;  %1251 = vmatmul.msk.f32.gmra.mxu1 %vm563_vm4, %v1395_v17 }
 0x144   :  { %1236 = vmatmul.msk.f32.gmra.mxu2 %vm563_vm4, %v1366_v18  ;;  %1220 = vmatmul.msk.f32.gmra.mxu0 %vm563_vm4, %v1334_v19 }
 0x14b   :  { %1268 = vmatmul.msk.f32.gmra.mxu3 %vm563_vm4, %v1430_v22  ;;  %1252 = vmatmul.msk.f32.gmra.mxu1 %vm563_vm4, %v1398_v23 }
 0x14c   :  { %1237 = vmatmul.msk.f32.gmra.mxu2 %vm563_vm4, %v1367_v24  ;;  %1221 = vmatmul.msk.f32.gmra.mxu0 %vm563_vm4, %v1335_v25 }
 0x153   :  { %1269 = vmatmul.msk.f32.gmra.mxu3 %vm563_vm4, %v1431_v28  ;;  %1253 = vmatmul.msk.f32.gmra.mxu1 %vm563_vm4, %v1399_v29 }
 0x154   :  { %1238 = vmatmul.msk.f32.gmra.mxu2 %vm563_vm4, %v1370_v30  ;;  %1222 = vmatmul.msk.f32.gmra.mxu0 %vm563_vm4, %v1338_v31 }
 0x15b   :  { %1270 = vmatmul.msk.f32.gmra.mxu3 %vm563_vm4, %v1434_v34  ;;  %1254 = vmatmul.msk.f32.gmra.mxu1 %vm563_vm4, %v1402_v35 }
 0x15c   :  { %1239 = vmatmul.msk.f32.gmra.mxu2 %vm563_vm4, %v1371_v36  ;;  %1223 = vmatmul.msk.f32.gmra.mxu0 %vm563_vm4, %v1339_v37 }
 0x160   :  { %v677_v40 = vpop.f32.mrf.mxu0 }
 0x161   :  { %982 = vst [vmem:[#allocation2] sm:$0xff] %v677_v40 }
 0x163   :  { %1271 = vmatmul.msk.f32.gmra.mxu3 %vm563_vm4, %v1435_v38  ;;  %1255 = vmatmul.msk.f32.gmra.mxu1 %vm563_vm4, %v1403_v39 }
 0x166   :  { %v725_v41 = vpop.f32.mrf.mxu2 }
 0x167   :  { %998 = vst [vmem:[#allocation2 + $0x80] sm:$0xff] %v725_v41 }
 0x168   :  { %v886_v42 = vpop.f32.mrf.mxu1 }
 0x169   :  { %1014 = vst [vmem:[#allocation2 + $0x100] sm:$0xff] %v886_v42  ;;  %v680_v43 = vpop.f32.mrf.mxu0 }
 0x16a   :  { %983 = vst [vmem:[#allocation2 + $0x8] sm:$0xff] %v680_v43 }
 0x16e   :  { %v934_v44 = vpop.f32.mrf.mxu3 }
 0x16f   :  { %1030 = vst [vmem:[#allocation2 + $0x180] sm:$0xff] %v934_v44  ;;  %v728_v45 = vpop.f32.mrf.mxu2 }
 0x170   :  { %999 = vst [vmem:[#allocation2 + $0x88] sm:$0xff] %v728_v45  ;;  %v889_v46 = vpop.f32.mrf.mxu1 }
 0x171   :  { %1015 = vst [vmem:[#allocation2 + $0x108] sm:$0xff] %v889_v46  ;;  %v683_v47 = vpop.f32.mrf.mxu0 }
 0x172   :  { %984 = vst [vmem:[#allocation2 + $0x10] sm:$0xff] %v683_v47 }
 0x176   :  { %v937_v48 = vpop.f32.mrf.mxu3 }
 0x177   :  { %1031 = vst [vmem:[#allocation2 + $0x188] sm:$0xff] %v937_v48  ;;  %v731_v49 = vpop.f32.mrf.mxu2 }
 0x178   :  { %1000 = vst [vmem:[#allocation2 + $0x90] sm:$0xff] %v731_v49  ;;  %v892_v50 = vpop.f32.mrf.mxu1 }
 0x179   :  { %1016 = vst [vmem:[#allocation2 + $0x110] sm:$0xff] %v892_v50  ;;  %v686_v51 = vpop.f32.mrf.mxu0 }
 0x17a   :  { %985 = vst [vmem:[#allocation2 + $0x18] sm:$0xff] %v686_v51 }
 0x17e   :  { %v940_v53 = vpop.f32.mrf.mxu3 }
 0x17f   :  { %1032 = vst [vmem:[#allocation2 + $0x190] sm:$0xff] %v940_v53  ;;  %v734_v54 = vpop.f32.mrf.mxu2 }
 0x180   :  { %1001 = vst [vmem:[#allocation2 + $0x98] sm:$0xff] %v734_v54  ;;  %v895_v55 = vpop.f32.mrf.mxu1 }
 0x181   :  { %1017 = vst [vmem:[#allocation2 + $0x118] sm:$0xff] %v895_v55  ;;  %v689_v56 = vpop.f32.mrf.mxu0 }
 0x182   :  { %986 = vst [vmem:[#allocation2 + $0x20] sm:$0xff] %v689_v56 }
 0x186   :  { %v943_v57 = vpop.f32.mrf.mxu3 }
 0x187   :  { %1033 = vst [vmem:[#allocation2 + $0x198] sm:$0xff] %v943_v57  ;;  %v737_v58 = vpop.f32.mrf.mxu2 }
 0x188   :  { %1002 = vst [vmem:[#allocation2 + $0xa0] sm:$0xff] %v737_v58  ;;  %v898_v59 = vpop.f32.mrf.mxu1 }
 0x189   :  { %1018 = vst [vmem:[#allocation2 + $0x120] sm:$0xff] %v898_v59  ;;  %v692_v60 = vpop.f32.mrf.mxu0 }
 0x18a   :  { %987 = vst [vmem:[#allocation2 + $0x28] sm:$0xff] %v692_v60 }
 0x18e   :  { %v946_v61 = vpop.f32.mrf.mxu3 }
 0x18f   :  { %1034 = vst [vmem:[#allocation2 + $0x1a0] sm:$0xff] %v946_v61  ;;  %v740_v62 = vpop.f32.mrf.mxu2 }
 0x190   :  { %1003 = vst [vmem:[#allocation2 + $0xa8] sm:$0xff] %v740_v62  ;;  %v901_v52 = vpop.f32.mrf.mxu1 }
 0x191   :  { %1019 = vst [vmem:[#allocation2 + $0x128] sm:$0xff] %v901_v52  ;;  %v695_v63 = vpop.f32.mrf.mxu0 }
 0x192   :  { %988 = vst [vmem:[#allocation2 + $0x30] sm:$0xff] %v695_v63 }
 0x196   :  { %v949_v0 = vpop.f32.mrf.mxu3 }
 0x197   :  { %1035 = vst [vmem:[#allocation2 + $0x1a8] sm:$0xff] %v949_v0  ;;  %v743_v1 = vpop.f32.mrf.mxu2 }
 0x198   :  { %1004 = vst [vmem:[#allocation2 + $0xb0] sm:$0xff] %v743_v1  ;;  %v904_v2 = vpop.f32.mrf.mxu1 }
 0x199   :  { %1020 = vst [vmem:[#allocation2 + $0x130] sm:$0xff] %v904_v2  ;;  %v698_v3 = vpop.f32.mrf.mxu0 }
 0x19a   :  { %989 = vst [vmem:[#allocation2 + $0x38] sm:$0xff] %v698_v3 }
 0x19e   :  { %v952_v4 = vpop.f32.mrf.mxu3 }
 0x19f   :  { %1036 = vst [vmem:[#allocation2 + $0x1b0] sm:$0xff] %v952_v4  ;;  %v746_v5 = vpop.f32.mrf.mxu2 }
 0x1a0   :  { %1005 = vst [vmem:[#allocation2 + $0xb8] sm:$0xff] %v746_v5  ;;  %v907_v6 = vpop.f32.mrf.mxu1 }
 0x1a1   :  { %1021 = vst [vmem:[#allocation2 + $0x138] sm:$0xff] %v907_v6  ;;  %v701_v7 = vpop.f32.mrf.mxu0 }
 0x1a2   :  { %990 = vst [vmem:[#allocation2 + $0x40] sm:$0xff] %v701_v7 }
 0x1a6   :  { %v955_v8 = vpop.f32.mrf.mxu3 }
 0x1a7   :  { %1037 = vst [vmem:[#allocation2 + $0x1b8] sm:$0xff] %v955_v8  ;;  %v749_v9 = vpop.f32.mrf.mxu2 }
 0x1a8   :  { %1006 = vst [vmem:[#allocation2 + $0xc0] sm:$0xff] %v749_v9  ;;  %v910_v10 = vpop.f32.mrf.mxu1 }
 0x1a9   :  { %1022 = vst [vmem:[#allocation2 + $0x140] sm:$0xff] %v910_v10  ;;  %v704_v11 = vpop.f32.mrf.mxu0 }
 0x1aa   :  { %991 = vst [vmem:[#allocation2 + $0x48] sm:$0xff] %v704_v11 }
 0x1ae   :  { %v958_v12 = vpop.f32.mrf.mxu3 }
 0x1af   :  { %1038 = vst [vmem:[#allocation2 + $0x1c0] sm:$0xff] %v958_v12  ;;  %v752_v13 = vpop.f32.mrf.mxu2 }
 0x1b0   :  { %1007 = vst [vmem:[#allocation2 + $0xc8] sm:$0xff] %v752_v13  ;;  %v913_v14 = vpop.f32.mrf.mxu1 }
 0x1b1   :  { %1023 = vst [vmem:[#allocation2 + $0x148] sm:$0xff] %v913_v14  ;;  %v707_v15 = vpop.f32.mrf.mxu0 }
 0x1b2   :  { %992 = vst [vmem:[#allocation2 + $0x50] sm:$0xff] %v707_v15 }
 0x1b6   :  { %v961_v16 = vpop.f32.mrf.mxu3 }
 0x1b7   :  { %1039 = vst [vmem:[#allocation2 + $0x1c8] sm:$0xff] %v961_v16  ;;  %v755_v17 = vpop.f32.mrf.mxu2 }
 0x1b8   :  { %1008 = vst [vmem:[#allocation2 + $0xd0] sm:$0xff] %v755_v17  ;;  %v916_v18 = vpop.f32.mrf.mxu1 }
 0x1b9   :  { %1024 = vst [vmem:[#allocation2 + $0x150] sm:$0xff] %v916_v18  ;;  %v710_v19 = vpop.f32.mrf.mxu0 }
 0x1ba   :  { %993 = vst [vmem:[#allocation2 + $0x58] sm:$0xff] %v710_v19 }
 0x1be   :  { %v964_v20 = vpop.f32.mrf.mxu3 }
 0x1bf   :  { %1040 = vst [vmem:[#allocation2 + $0x1d0] sm:$0xff] %v964_v20  ;;  %v758_v21 = vpop.f32.mrf.mxu2 }
 0x1c0   :  { %1009 = vst [vmem:[#allocation2 + $0xd8] sm:$0xff] %v758_v21  ;;  %v919_v22 = vpop.f32.mrf.mxu1 }
 0x1c1   :  { %1025 = vst [vmem:[#allocation2 + $0x158] sm:$0xff] %v919_v22  ;;  %v713_v23 = vpop.f32.mrf.mxu0 }
 0x1c2   :  { %994 = vst [vmem:[#allocation2 + $0x60] sm:$0xff] %v713_v23 }
 0x1c6   :  { %v967_v24 = vpop.f32.mrf.mxu3 }
 0x1c7   :  { %1041 = vst [vmem:[#allocation2 + $0x1d8] sm:$0xff] %v967_v24  ;;  %v761_v25 = vpop.f32.mrf.mxu2 }
 0x1c8   :  { %1010 = vst [vmem:[#allocation2 + $0xe0] sm:$0xff] %v761_v25  ;;  %v922_v26 = vpop.f32.mrf.mxu1 }
 0x1c9   :  { %1026 = vst [vmem:[#allocation2 + $0x160] sm:$0xff] %v922_v26  ;;  %v716_v27 = vpop.f32.mrf.mxu0 }
 0x1ca   :  { %995 = vst [vmem:[#allocation2 + $0x68] sm:$0xff] %v716_v27 }
 0x1ce   :  { %v970_v28 = vpop.f32.mrf.mxu3 }
 0x1cf   :  { %1042 = vst [vmem:[#allocation2 + $0x1e0] sm:$0xff] %v970_v28  ;;  %v764_v29 = vpop.f32.mrf.mxu2 }
 0x1d0   :  { %1011 = vst [vmem:[#allocation2 + $0xe8] sm:$0xff] %v764_v29  ;;  %v925_v30 = vpop.f32.mrf.mxu1 }
 0x1d1   :  { %1027 = vst [vmem:[#allocation2 + $0x168] sm:$0xff] %v925_v30  ;;  %v719_v31 = vpop.f32.mrf.mxu0 }
 0x1d2   :  { %996 = vst [vmem:[#allocation2 + $0x70] sm:$0xff] %v719_v31 }
 0x1d6   :  { %v973_v32 = vpop.f32.mrf.mxu3 }
 0x1d7   :  { %1043 = vst [vmem:[#allocation2 + $0x1e8] sm:$0xff] %v973_v32  ;;  %v767_v33 = vpop.f32.mrf.mxu2 }
 0x1d8   :  { %1012 = vst [vmem:[#allocation2 + $0xf0] sm:$0xff] %v767_v33  ;;  %v928_v34 = vpop.f32.mrf.mxu1 }
 0x1d9   :  { %1028 = vst [vmem:[#allocation2 + $0x170] sm:$0xff] %v928_v34  ;;  %v722_v35 = vpop.f32.mrf.mxu0 }
 0x1da   :  { %997 = vst [vmem:[#allocation2 + $0x78] sm:$0xff] %v722_v35 }
 0x1de   :  { %v976_v36 = vpop.f32.mrf.mxu3 }
 0x1df   :  { %1044 = vst [vmem:[#allocation2 + $0x1f0] sm:$0xff] %v976_v36  ;;  %v770_v37 = vpop.f32.mrf.mxu2 }
 0x1e0   :  { %1013 = vst [vmem:[#allocation2 + $0xf8] sm:$0xff] %v770_v37  ;;  %v931_v38 = vpop.f32.mrf.mxu1 }
 0x1e1   :  { %1029 = vst [vmem:[#allocation2 + $0x178] sm:$0xff] %v931_v38 }
 0x1e6   :  { %v979_v39 = vpop.f32.mrf.mxu3 }
 0x1e7   :  { %1045 = vst [vmem:[#allocation2 + $0x1f8] sm:$0xff] %v979_v39 }
 0x1e8   :  { %1058 = dma.vmem_to_hbm [thread:$0]  %s1051_s15, 8192, %s1053_s18, [#allocation3], %s1521_s19, %s1521_s19, %s1522_s20  }
 0x1e9   :  { %1518 = dma.done.wait [#allocation3], 8192  }
 0x1ea   :  { %1519 = vsyncadd [#allocation3], 4294959104 }
 0x1eb   :  { %1063 = vsyncpa [#allocation3], 1 }

</bundles_post_ra>
